<compile_context>
chip_gen: v6e
topology: v6e:2x2x1
jax: 0.10.0
libtpu: 0.0.40
codegen_flags: <defaults>
</compile_context>

<pallas_src>
import functools

import jax
import jax.numpy as jnp
from jax import lax
from jax.experimental import pallas as pl
from jax.experimental.pallas import tpu as pltpu


def _postprocessing_kernel(x_ref, wc_ref, shift_ref, wl_ref, bl_ref, out_ref,
                           acc_ref, *, tile_n, inv_hw):
    """One (batch-tile, hw-tile) grid step.

    x_ref:     (tile_n, Cin, tile_hw)  native NC(HW) layout -> lane-dense on HW
    wc_ref:    (Cout, Cin)      bf16, BN scale folded in
    shift_ref: (Cout, 1)        f32 folded BN shift
    wl_ref:    (Cout, n_class)  bf16 classifier weight (pre-transposed)
    bl_ref:    (1, n_class)     f32 classifier bias
    out_ref:   (tile_n, n_class) f32, written once at the last hw tile
    acc_ref:   (Cout, tile_n)   f32 scratch, resident across the hw axis
    """
    t = pl.program_id(1)

    @pl.when(t == 0)
    def _init():
        acc_ref[...] = jnp.zeros_like(acc_ref)

    # 1x1 conv on the MXU in the native (Cin, HW) orientation, per image in the
    # batch tile (tile_n is small & static -> unrolled Python loop).  BN shift +
    # ReLU6 in f32, then a lane (XLU) partial sum for the global average pool.
    for n in range(tile_n):
        xn = x_ref[n].astype(jnp.bfloat16)                       # (Cin, tile_hw)
        h = jnp.dot(wc_ref[...], xn,
                    preferred_element_type=jnp.float32)          # (Cout, tile_hw)
        h = jnp.clip(h + shift_ref[...], 0.0, 6.0)               # BN shift + ReLU6
        acc_ref[:, n:n + 1] += jnp.sum(h, axis=-1, keepdims=True)  # (Cout, 1)

    @pl.when(t == pl.num_programs(1) - 1)
    def _finalize():
        # Scale pooled sums by 1/HW; classifier as transposed-LHS dot_general
        # (MXU-native) so the (tile_n, n_class) output stays lane-dense.
        pooled_t = (acc_ref[...] * inv_hw).astype(jnp.bfloat16)  # (Cout, tile_n)
        logits = lax.dot_general(
            pooled_t, wl_ref[...],
            dimension_numbers=(((0,), (0,)), ((), ())),
            preferred_element_type=jnp.float32)                  # (tile_n, n_class)
        out_ref[...] = (logits + bl_ref[...]).astype(out_ref.dtype)


def prepare_postprocessing_params(w_conv, bn_gamma, bn_beta, bn_mean, bn_var,
                                  w_cls, b_cls, eps=1e-5):
    """One-time (inference-constant) parameter prep: BN fold + bf16 cast.

    Hoisted out of the per-call path so the forward does no per-call XLA work
    on the weights.
    """
    cout, cin = w_conv.shape[0], w_conv.shape[1]
    n_class = w_cls.shape[0]
    scale = bn_gamma / jnp.sqrt(bn_var + eps)                                 # (Cout,)
    wc = (w_conv.reshape(cout, cin) * scale[:, None]).astype(jnp.bfloat16)    # (Cout, Cin)
    shift = (bn_beta - bn_mean * scale).reshape(cout, 1).astype(jnp.float32)  # (Cout, 1)
    wl = jnp.transpose(w_cls).astype(jnp.bfloat16)                            # (Cout, n_class)
    bl = b_cls.reshape(1, n_class).astype(jnp.float32)                        # (1, n_class)
    return {"wc": wc, "shift": shift, "wl": wl, "bl": bl}


def postprocessing_forward(x_nchw, params, *, tile_n=None, tile_hw=None):
    """x_nchw: (N, Cin, H, W) activations.  Returns (N, n_class) f32 logits."""
    N, Cin, H, W = x_nchw.shape
    HW = H * W
    Cout, n_class = params["wl"].shape

    # Native-layout reshape only (no NCHW->NHWC transpose, no extra HBM pass).
    x3 = x_nchw.reshape(N, Cin, HW)

    # Batch-tile ("parallel": feeds v7x's two TensorCores at real batch sizes)
    # and HW-tile ("arbitrary": reduction axis with a resident accumulator).
    if tile_n is None:
        tile_n = 8 if N % 8 == 0 else N
    if tile_hw is None:
        if HW <= 2048:
            tile_hw = HW
        elif HW % 512 == 0:
            tile_hw = 512          # keeps double-buffered blocks well under VMEM
        else:
            tile_hw = HW           # TODO(synk): masked ragged last tile for odd HW
    assert N % tile_n == 0 and HW % tile_hw == 0
    grid = (N // tile_n, HW // tile_hw)

    kernel = functools.partial(_postprocessing_kernel,
                               tile_n=tile_n, inv_hw=1.0 / HW)

    cost = pl.CostEstimate(
        flops=2 * N * HW * Cin * Cout + 2 * N * Cout * n_class,
        transcendentals=0,
        bytes_accessed=(N * Cin * HW * x3.dtype.itemsize + Cout * Cin * 2
                        + Cout * 4 + Cout * n_class * 2 + n_class * 4
                        + N * n_class * 4))

    return pl.pallas_call(
        kernel,
        out_shape=jax.ShapeDtypeStruct((N, n_class), jnp.float32),
        grid=grid,
        in_specs=[
            pl.BlockSpec((tile_n, Cin, tile_hw), lambda b, t: (b, 0, t)),
            pl.BlockSpec((Cout, Cin), lambda b, t: (0, 0)),
            pl.BlockSpec((Cout, 1), lambda b, t: (0, 0)),
            pl.BlockSpec((Cout, n_class), lambda b, t: (0, 0)),
            pl.BlockSpec((1, n_class), lambda b, t: (0, 0)),
        ],
        out_specs=pl.BlockSpec((tile_n, n_class), lambda b, t: (b, 0)),
        scratch_shapes=[pltpu.VMEM((Cout, tile_n), jnp.float32)],
        compiler_params=pltpu.CompilerParams(
            dimension_semantics=("parallel", "arbitrary"),
            # v5e default scoped VMEM is only 16 MiB; be explicit (32 MiB fits
            # every chip's physical VMEM and is far above this kernel's usage).
            vmem_limit_bytes=32 * 1024 * 1024),
        cost_estimate=cost,
    )(x3, params["wc"], params["shift"], params["wl"], params["bl"])


if __name__ == "__main__":
    # Shapes consistent with the module: inp=8, oup=32, input_size=256
    # -> AvgPool2d kernel = 256 // 32 = 8 = H = W, n_class=128, batch=2.
    N, Cin, Cout, H, W, n_class = 2, 8, 32, 8, 8, 128

    key = jax.random.PRNGKey(0)
    ks = jax.random.split(key, 8)

    x = jax.random.normal(ks[0], (N, Cin, H, W), dtype=jnp.float32)
    w_conv = jax.random.normal(ks[1], (Cout, Cin, 1, 1), dtype=jnp.float32) * 0.1
    bn_gamma = 1.0 + 0.1 * jax.random.normal(ks[2], (Cout,), dtype=jnp.float32)
    bn_beta = 0.1 * jax.random.normal(ks[3], (Cout,), dtype=jnp.float32)
    bn_mean = 0.05 * jax.random.normal(ks[4], (Cout,), dtype=jnp.float32)
    bn_var = jnp.abs(1.0 + 0.1 * jax.random.normal(ks[5], (Cout,), dtype=jnp.float32))
    w_cls = jax.random.normal(ks[6], (n_class, Cout), dtype=jnp.float32) * 0.1
    b_cls = 0.01 * jax.random.normal(ks[7], (n_class,), dtype=jnp.float32)

    params = prepare_postprocessing_params(w_conv, bn_gamma, bn_beta, bn_mean,
                                           bn_var, w_cls, b_cls)
    out = postprocessing_forward(x, params)
    out = jax.block_until_ready(out)
    assert out.shape == (N, n_class)

    # ---------------- references ----------------
    eps = 1e-5
    xr = x.reshape(N, Cin, H * W)
    scale = bn_gamma / jnp.sqrt(bn_var + eps)
    wc_f32 = w_conv.reshape(Cout, Cin) * scale[:, None]
    shift = bn_beta - bn_mean * scale

    def ref_fwd(x_in, wc_in, wl_in, pooled_cast):
        h = jnp.einsum("oc,nch->noh", wc_in, x_in) + shift[None, :, None]
        h = jnp.clip(h, 0.0, 6.0)
        pooled = pooled_cast(jnp.mean(h, axis=-1))
        return pooled @ wl_in + b_cls[None, :]

    as_bf = lambda a: a.astype(jnp.bfloat16).astype(jnp.float32)
    # Tight check: bf16-input / f32-accumulate reference matching the MXU path.
    ref_bf = ref_fwd(as_bf(xr), as_bf(wc_f32), as_bf(w_cls.T), as_bf)
    # Loose check: full-f32 eval-mode PyTorch semantics (bf16 MXU inputs in kernel).
    ref_f32 = ref_fwd(xr, wc_f32, w_cls.T, lambda p: p)

    assert jnp.allclose(out, ref_bf, atol=2e-3, rtol=2e-3), \
        float(jnp.max(jnp.abs(out - ref_bf)))
    assert jnp.allclose(out, ref_f32, atol=2e-2, rtol=2e-2), \
        float(jnp.max(jnp.abs(out - ref_f32)))

    print("KERNEL_OK")
</pallas_src>

<mosaic_0001>
module attributes {stable_mosaic.version = 11 : i64} {
  func.func @_postprocessing_kernel(%arg0: i32, %arg1: i32, %arg2: memref<2x8x64xf32, #tpu.memory_space<vmem>>, %arg3: memref<32x8xbf16, #tpu.memory_space<vmem>>, %arg4: memref<32x1xf32, #tpu.memory_space<vmem>>, %arg5: memref<32x128xbf16, #tpu.memory_space<vmem>>, %arg6: memref<1x128xf32, #tpu.memory_space<vmem>>, %arg7: memref<2x128xf32, #tpu.memory_space<vmem>>, %arg8: memref<32x2xf32, #tpu.memory_space<vmem>>) attributes {dimension_semantics = [#tpu.dimension_semantics<parallel>, #tpu.dimension_semantics<arbitrary>], iteration_bounds = array<i64: 1, 1>, scalar_prefetch = 0 : i64, scratch_operands = 1 : i64, tpu.core_type = #tpu.core_type<tc>, window_params = [{transform_indices = @transform_0, window_bounds = array<i64: 2, 8, 64>}, {pipeline_mode = #tpu.pipeline_mode<synchronous>, transform_indices = @transform_1, window_bounds = array<i64: 32, 8>}, {pipeline_mode = #tpu.pipeline_mode<synchronous>, transform_indices = @transform_2, window_bounds = array<i64: 32, 1>}, {pipeline_mode = #tpu.pipeline_mode<synchronous>, transform_indices = @transform_3, window_bounds = array<i64: 32, 128>}, {pipeline_mode = #tpu.pipeline_mode<synchronous>, transform_indices = @transform_4, window_bounds = array<i64: 1, 128>}, {transform_indices = @transform_5, window_bounds = array<i64: 2, 128>}]} {
    %c0_i32 = arith.constant 0 : i32
    %0 = arith.cmpi eq, %arg1, %c0_i32 : i32
    %1 = arith.extui %0 : i1 to i32
    %c0_i32_0 = arith.constant 0 : i32
    %2 = arith.cmpi ne, %1, %c0_i32_0 : i32
    scf.if %2 {
      %cst_30 = arith.constant 0.000000e+00 : f32
      %40 = vector.broadcast %cst_30 : f32 to vector<32x2xf32>
      %c0_31 = arith.constant 0 : index
      %c0_32 = arith.constant 0 : index
      %41 = vector.load %arg8[%c0_31, %c0_32] : memref<32x2xf32, #tpu.memory_space<vmem>>, vector<32x2xf32>
      tpu.vector_store %arg8[%c0_31, %c0_32], %40 {strides = array<i32>} : memref<32x2xf32, #tpu.memory_space<vmem>>, vector<32x2xf32>,
    } else {
    }
    %c0 = arith.constant 0 : index
    %c0_1 = arith.constant 0 : index
    %c0_2 = arith.constant 0 : index
    %3 = vector.load %arg2[%c0, %c0_1, %c0_2] : memref<2x8x64xf32, #tpu.memory_space<vmem>>, vector<1x8x64xf32>
    %4 = vector.shape_cast %3 : vector<1x8x64xf32> to vector<8x64xf32>
    %5 = arith.truncf %4 : vector<8x64xf32> to vector<8x64xbf16>
    %c0_3 = arith.constant 0 : index
    %c0_4 = arith.constant 0 : index
    %6 = vector.load %arg3[%c0_3, %c0_4] : memref<32x8xbf16, #tpu.memory_space<vmem>>, vector<32x8xbf16>
    %cst = arith.constant dense<0.000000e+00> : vector<32x64xf32>
    %7 = tpu.matmul %6, %5, %cst {dimension_numbers = #tpu.dot_dimension_numbers<[1], [0], [0], [1], [0, 0, 1, 1], [], []>} : vector<32x8xbf16>, vector<8x64xbf16>, vector<32x64xf32> -> vector<32x64xf32>
    %c0_5 = arith.constant 0 : index
    %c0_6 = arith.constant 0 : index
    %8 = vector.load %arg4[%c0_5, %c0_6] : memref<32x1xf32, #tpu.memory_space<vmem>>, vector<32x1xf32>
    %9 = vector.broadcast %8 : vector<32x1xf32> to vector<32x64xf32>
    %10 = arith.addf %7, %9 : vector<32x64xf32>
    %cst_7 = arith.constant 0.000000e+00 : f32
    %cst_8 = arith.constant 6.000000e+00 : f32
    %11 = vector.broadcast %cst_7 : f32 to vector<32x64xf32>
    %12 = arith.maximumf %11, %10 : vector<32x64xf32>
    %13 = vector.broadcast %cst_8 : f32 to vector<32x64xf32>
    %14 = arith.minimumf %13, %12 : vector<32x64xf32>
    %c0_9 = arith.constant 0 : index
    %c0_10 = arith.constant 0 : index
    %15 = vector.load %arg8[%c0_9, %c0_10] : memref<32x2xf32, #tpu.memory_space<vmem>>, vector<32x1xf32>
    %cst_11 = arith.constant dense<0.000000e+00> : vector<32xf32>
    %16 = vector.multi_reduction <add>, %14, %cst_11 [1] : vector<32x64xf32> to vector<32xf32>
    %17 = vector.shape_cast %16 : vector<32xf32> to vector<32x1xf32>
    %18 = arith.addf %15, %17 : vector<32x1xf32>
    %c0_12 = arith.constant 0 : index
    %c0_13 = arith.constant 0 : index
    %19 = vector.load %arg8[%c0_12, %c0_13] : memref<32x2xf32, #tpu.memory_space<vmem>>, vector<32x1xf32>
    tpu.vector_store %arg8[%c0_12, %c0_13], %18 {strides = array<i32>} : memref<32x2xf32, #tpu.memory_space<vmem>>, vector<32x1xf32>,
    %c1 = arith.constant 1 : index
    %c0_14 = arith.constant 0 : index
    %c0_15 = arith.constant 0 : index
    %20 = vector.load %arg2[%c1, %c0_14, %c0_15] : memref<2x8x64xf32, #tpu.memory_space<vmem>>, vector<1x8x64xf32>
    %21 = vector.shape_cast %20 : vector<1x8x64xf32> to vector<8x64xf32>
    %22 = arith.truncf %21 : vector<8x64xf32> to vector<8x64xbf16>
    %c0_16 = arith.constant 0 : index
    %c0_17 = arith.constant 0 : index
    %23 = vector.load %arg3[%c0_16, %c0_17] : memref<32x8xbf16, #tpu.memory_space<vmem>>, vector<32x8xbf16>
    %cst_18 = arith.constant dense<0.000000e+00> : vector<32x64xf32>
    %24 = tpu.matmul %23, %22, %cst_18 {dimension_numbers = #tpu.dot_dimension_numbers<[1], [0], [0], [1], [0, 0, 1, 1], [], []>} : vector<32x8xbf16>, vector<8x64xbf16>, vector<32x64xf32> -> vector<32x64xf32>
    %c0_19 = arith.constant 0 : index
    %c0_20 = arith.constant 0 : index
    %25 = vector.load %arg4[%c0_19, %c0_20] : memref<32x1xf32, #tpu.memory_space<vmem>>, vector<32x1xf32>
    %26 = vector.broadcast %25 : vector<32x1xf32> to vector<32x64xf32>
    %27 = arith.addf %24, %26 : vector<32x64xf32>
    %cst_21 = arith.constant 0.000000e+00 : f32
    %cst_22 = arith.constant 6.000000e+00 : f32
    %28 = vector.broadcast %cst_21 : f32 to vector<32x64xf32>
    %29 = arith.maximumf %28, %27 : vector<32x64xf32>
    %30 = vector.broadcast %cst_22 : f32 to vector<32x64xf32>
    %31 = arith.minimumf %30, %29 : vector<32x64xf32>
    %c0_23 = arith.constant 0 : index
    %c1_24 = arith.constant 1 : index
    %32 = vector.load %arg8[%c0_23, %c1_24] : memref<32x2xf32, #tpu.memory_space<vmem>>, vector<32x1xf32>
    %cst_25 = arith.constant dense<0.000000e+00> : vector<32xf32>
    %33 = vector.multi_reduction <add>, %31, %cst_25 [1] : vector<32x64xf32> to vector<32xf32>
    %34 = vector.shape_cast %33 : vector<32xf32> to vector<32x1xf32>
    %35 = arith.addf %32, %34 : vector<32x1xf32>
    %c0_26 = arith.constant 0 : index
    %c1_27 = arith.constant 1 : index
    %36 = vector.load %arg8[%c0_26, %c1_27] : memref<32x2xf32, #tpu.memory_space<vmem>>, vector<32x1xf32>
    tpu.vector_store %arg8[%c0_26, %c1_27], %35 {strides = array<i32>} : memref<32x2xf32, #tpu.memory_space<vmem>>, vector<32x1xf32>,
    %c0_i32_28 = arith.constant 0 : i32
    %37 = arith.cmpi eq, %arg1, %c0_i32_28 : i32
    %38 = arith.extui %37 : i1 to i32
    %c0_i32_29 = arith.constant 0 : i32
    %39 = arith.cmpi ne, %38, %c0_i32_29 : i32
    scf.if %39 {
      %c0_30 = arith.constant 0 : index
      %c0_31 = arith.constant 0 : index
      %40 = vector.load %arg8[%c0_30, %c0_31] : memref<32x2xf32, #tpu.memory_space<vmem>>, vector<32x2xf32>
      %cst_32 = arith.constant 1.562500e-02 : f32
      %41 = vector.broadcast %cst_32 : f32 to vector<32x2xf32>
      %42 = arith.mulf %40, %41 : vector<32x2xf32>
      %43 = arith.truncf %42 : vector<32x2xf32> to vector<32x2xbf16>
      %c0_33 = arith.constant 0 : index
      %c0_34 = arith.constant 0 : index
      %44 = vector.load %arg5[%c0_33, %c0_34] : memref<32x128xbf16, #tpu.memory_space<vmem>>, vector<32x128xbf16>
      %cst_35 = arith.constant dense<0.000000e+00> : vector<2x128xf32>
      %45 = tpu.matmul %43, %44, %cst_35 {dimension_numbers = #tpu.dot_dimension_numbers<[0], [0], [1], [1], [0, 1, 1, 1], [], []>} : vector<32x2xbf16>, vector<32x128xbf16>, vector<2x128xf32> -> vector<2x128xf32>
      %c0_36 = arith.constant 0 : index
      %c0_37 = arith.constant 0 : index
      %46 = vector.load %arg6[%c0_36, %c0_37] : memref<1x128xf32, #tpu.memory_space<vmem>>, vector<1x128xf32>
      %47 = vector.broadcast %46 : vector<1x128xf32> to vector<2x128xf32>
      %48 = arith.addf %45, %47 : vector<2x128xf32>
      %c0_38 = arith.constant 0 : index
      %c0_39 = arith.constant 0 : index
      %49 = vector.load %arg7[%c0_38, %c0_39] : memref<2x128xf32, #tpu.memory_space<vmem>>, vector<2x128xf32>
      tpu.vector_store %arg7[%c0_38, %c0_39], %48 {strides = array<i32>} : memref<2x128xf32, #tpu.memory_space<vmem>>, vector<2x128xf32>,
    } else {
    }
    return
  }
  func.func @transform_0(%arg0: i32, %arg1: i32) -> (i32, i32, i32) {
    %c0_i32 = arith.constant 0 : i32
    %c0_i32_0 = arith.constant 0 : i32
    return %arg0, %c0_i32, %arg1 : i32, i32, i32
  }
  func.func @transform_1(%arg0: i32, %arg1: i32) -> (i32, i32) {
    %c0_i32 = arith.constant 0 : i32
    %c0_i32_0 = arith.constant 0 : i32
    %c0_i32_1 = arith.constant 0 : i32
    return %c0_i32, %c0_i32_0 : i32, i32
  }
  func.func @transform_2(%arg0: i32, %arg1: i32) -> (i32, i32) {
    %c0_i32 = arith.constant 0 : i32
    %c0_i32_0 = arith.constant 0 : i32
    %c0_i32_1 = arith.constant 0 : i32
    return %c0_i32, %c0_i32_0 : i32, i32
  }
  func.func @transform_3(%arg0: i32, %arg1: i32) -> (i32, i32) {
    %c0_i32 = arith.constant 0 : i32
    %c0_i32_0 = arith.constant 0 : i32
    %c0_i32_1 = arith.constant 0 : i32
    return %c0_i32, %c0_i32_0 : i32, i32
  }
  func.func @transform_4(%arg0: i32, %arg1: i32) -> (i32, i32) {
    %c0_i32 = arith.constant 0 : i32
    %c0_i32_0 = arith.constant 0 : i32
    %c0_i32_1 = arith.constant 0 : i32
    return %c0_i32, %c0_i32_0 : i32, i32
  }
  func.func @transform_5(%arg0: i32, %arg1: i32) -> (i32, i32) {
    %c0_i32 = arith.constant 0 : i32
    %c0_i32_0 = arith.constant 0 : i32
    return %arg0, %c0_i32 : i32, i32
  }
}

</mosaic_0001>

<bundles_post_ra>
// kernel: tpu_custom_call.1
= control target key start
LH: loop header
LB: loop body
LE: loop exit
PB: predicated region body
PF: predicated region fallthrough
CT: control target
= control target key end

     0   :  { %vm78_vm0 = vcmask 1043456   ;;  %vm71_vm1 = vcmask 64512   ;;  %v486_v6 = vmov 0   ;;  %s582_s0 = inlined_call_operand.vmem [shape: f32[2,8,64], index: 0, kind: input, shape index: {}]   ;;  %s583_s1 = inlined_call_operand.vmem [shape: bf16[32,8], index: 1, kind: input, shape index: {}]   ;;  %s584_s2 = inlined_call_operand.vmem [shape: f32[32,1], index: 2, kind: input, shape index: {}]   ;;  %s585_s3 = inlined_call_operand.vmem [shape: bf16[32,128], index: 3, kind: input, shape index: {}]   ;;  %s586_s4 = inlined_call_operand.vmem [shape: f32[1,128], index: 4, kind: input, shape index: {}]   ;;  %s587_s5 = inlined_call_operand.hbm [shape: f32[2,128], index: 5, kind: output, shape index: {}]  }
   0x1   :  { %v31_v0 = vld [vmem:[%s582_s0] sm:$0xff]  ;;  %v412_v1 = vld [vmem:[%s582_s0 + $0x8] sm:$0xff]  ;;  %456 = vset.pattern.permute.xlu0 %v486_v6  ;;  %457 = vset.pattern.permute.xlu1 %v486_v6  ;;  %v39_v12 = vld [vmem:[%s584_s2 + $0x10] sm:$0xff] }
   0x2   :  { %v32_v2 = vpack.c.bf16 %v31_v0, %v31_v0  ;;  %v167_v3 = vpack.c.bf16 %v412_v1, %v412_v1  ;;  %v458_v4 = vld [vmem:[%s583_s1] sm:$0xff]   ;;  %v460_v9 = vld [vmem:[%s583_s1 + $0x8] sm:$0xff]   ;;  %53 = vperm.xlu1 %457, %v39_v12   ;;  %v40_v14 = vld [vmem:[%s584_s2 + $0x18] sm:$0xff] }
   0x3   :  { %v459_v5 = vld [vmem:[%s583_s1] sm:$0xff]   ;;  %v461_v10 = vld [vmem:[%s583_s1 + $0x8] sm:$0xff]   ;;  %432 = vmatprep.mubr.msk.bf16.mxu0 %vm71_vm1, %v458_v4 }
   0x4   :  { %450 = vmatprep.subr.msk.bf16.mxu0 %vm78_vm0, %v32_v2  ;;  %451 = vmatprep.subr.msk.bf16.mxu1 %vm78_vm0, %v167_v3  ;;  %v80_v7 = vsel %vm78_vm0, %v32_v2, 0  ;;  %v213_v8 = vsel %vm78_vm0, %v167_v3, 0  ;;  %v37_v11 = vld [vmem:[%s584_s2] sm:$0xff]  ;;  %v38_v13 = vld [vmem:[%s584_s2 + $0x8] sm:$0xff] }
   0x5   :  { %431 = vmatpush3.bf16.msra.mxu0 %v80_v7  ;;  %437 = vmatpush3.bf16.msra.mxu1 %v213_v8 }
   0x6   :  { %438 = vmatprep.mubr.msk.bf16.mxu1 %vm71_vm1, %v459_v5  ;;  %43 = vperm.xlu0 %456, %v37_v11  }
   0x8   :  { %433 = vmatmul.mubr.msk.bf16.vlgmr.msra.gmra.mxu0 %vm71_vm1, %v460_v9  ;;  %439 = vmatmul.mubr.msk.bf16.vlgmr.msra.gmra.mxu1 %vm71_vm1, %v461_v10 }
   0x9   :  { %10 = vsyncpa [#allocation4], 0  ;;  %58 = vperm.xlu1 %457, %v40_v14   ;;  %vm143_vm2 = vcmask 523264   ;;  %vm26_vm3 = vcmask 15360   ;;  %v487_v54 = vmov 0.0   ;;  %v462_v0 = vld [vmem:[%s585_s3 + $0x8] sm:$0xff]  }
   0xa   :  { %48 = vperm.xlu0 %456, %v38_v13   ;;  %27 = vst.msk [vmem:[#allocation2] sm:$0xff] %vm26_vm3, %v487_v54  ;;  %28 = vst.msk [vmem:[#allocation2 + $0x8] sm:$0xff] %vm26_vm3, %v487_v54  ;;  %442 = vmatprep.subr.bf16.mxu0 %v487_v54  ;;  %vm488_vm4 = vmmov 0   ;;  %v463_v1 = vld [vmem:[%s585_s3] sm:$0xff]   ;;  %vm160_vm5 = vcmask 7168   ;;  %vm292_vm6 = vcmask 15368  }
   0xb   :  { %29 = vst.msk [vmem:[#allocation2 + $0x10] sm:$0xff] %vm26_vm3, %v487_v54  ;;  %30 = vst.msk [vmem:[#allocation2 + $0x18] sm:$0xff] %vm26_vm3, %v487_v54  ;;  %446 = vmatprep.mubr.msk.bf16.mxu0 %vm488_vm4, %v487_v54  ;;  %443 = vmatpush3.bf16.msra.mxu0 %v462_v0  ;;  %vm349_vm7 = vcmask 261120   ;;  %s489_s15 = smov [#allocation3]  }
   0xc   :  { %444 = vmatprep.subr.bf16.mxu0 %v487_v54  ;;  %s400_s16 = sshll.u32 %s489_s15, 4  ;;  %s401_s16 = int_to_ptr.vmem [resolvable:$true] %s400_s16 }
   0xd   :  { %183 = vperm.xlu1 %457, %v38_v13   ;;  %s464_s17 = scalar_lea.vmem %s401_s16, 32  ;;  %p469_p1 = scmp.lt.s32.totalorder %s401_s16, %s401_s16 }
   0xe   :  { %178 = vperm.xlu0 %456, %v37_v11   ;;  %p465_p0 = scmp.ne.s32.totalorder %s401_s16, %s464_s17  ;;  %p470_p2 = scmp.lt.s32.totalorder %s464_s17, %s464_s17 }
   0xf   :  { %445 = vmatpush3.bf16.msra.mxu0 %v463_v1 }
  0x10   :  { %p471_p3 = por %p470_p2, %p469_p1 }
  0x11   :  { %193 = vperm.xlu1 %457, %v40_v14   ;;  %v139_v2 = vld [vmem:[#allocation2] sm:$0xff]  ;;  %v140_v5 = vld [vmem:[#allocation2 + $0x8] sm:$0xff] }
  0x12   :  { %188 = vperm.xlu0 %456, %v39_v12   ;;  %v141_v6 = vld [vmem:[#allocation2 + $0x10] sm:$0xff]  ;;  %v142_v11 = vld [vmem:[#allocation2 + $0x18] sm:$0xff]  ;;  %p472_p4 = pnand %p471_p3, %p465_p0 }
  0x7d   :  { %v54_v16 = vpop.permute.xlu1 %53 }
  0x81   :  { %v44_v15 = vpop.permute.xlu0 %43 }
  0x84   :  { %v59_v18 = vpop.permute.xlu1 %58 }
  0x85   :  { %v49_v17 = vpop.permute.xlu0 %48 }
  0x88   :  { %v184_v25 = vpop.permute.xlu1 %183 }
  0x89   :  { %v179_v19 = vpop.permute.xlu0 %178 }
  0x8c   :  { %v194_v43 = vpop.permute.xlu1 %193 }
  0x8d   :  { %v189_v26 = vpop.permute.xlu0 %188 }
  0xc8   :  { %v434_v20 = vpop.f32.mrf.mxu0  ;;  %v440_v21 = vpop.f32.mrf.mxu1 }
  0xc9   :  { %v125_v22 = vadd.f32 %v434_v20, %v54_v16  ;;  %v258_v36 = vadd.f32 %v440_v21, %v189_v26 }
  0xca   :  { %v249_v23 = vpop.f32.mrf.mxu1  ;;  %v116_v24 = vpop.f32.mrf.mxu0 }
  0xcb   :  { %v117_v27 = vadd.f32 %v116_v24, %v44_v15  ;;  %v133_v28 = vmax.f32 %v125_v22, 0.0  ;;  %v250_v29 = vadd.f32 %v249_v23, %v179_v19  ;;  %v266_v46 = vmax.f32 %v258_v36, 0.0 }
  0xcc   :  { %v435_v30 = vpop.f32.mrf.mxu0  ;;  %v441_v31 = vpop.f32.mrf.mxu1 }
  0xcd   :  { %v131_v32 = vmax.f32 %v117_v27, 0.0  ;;  %v128_v33 = vadd.f32 %v435_v30, %v59_v18  ;;  %v137_v39 = vmin.f32 %v133_v28, 6.0  ;;  %v264_v40 = vmax.f32 %v250_v29, 0.0 }
  0xce   :  { %v252_v34 = vpop.f32.mrf.mxu1  ;;  %v119_v35 = vpop.f32.mrf.mxu0  ;;  %v261_v49 = vadd.f32 %v441_v31, %v194_v43  ;;  %v270_v55 = vmin.f32 %v266_v46, 6.0 }
  0xcf   :  { %v135_v37 = vmin.f32 %v131_v32, 6.0  ;;  %v120_v38 = vadd.f32 %v119_v35, %v49_v17  ;;  %v134_v41 = vmax.f32 %v128_v33, 0.0  ;;  %v253_v42 = vadd.f32 %v252_v34, %v184_v25 }
  0xd0   :  { %v268_v48 = vmin.f32 %v264_v40, 6.0  ;;  %v150_v53 = vsel %vm143_vm2, %v137_v39, 0.0  ;;  %v267_v57 = vmax.f32 %v261_v49, 0.0  ;;  %v282_v61 = vsel %vm143_vm2, %v270_v55, 0.0 }
  0xd1   :  { %v132_v44 = vmax.f32 %v120_v38, 0.0  ;;  %v144_v45 = vsel %vm143_vm2, %v135_v37, 0.0  ;;  %v138_v50 = vmin.f32 %v134_v41, 6.0  ;;  %v265_v51 = vmax.f32 %v253_v42, 0.0  ;;  %v417_v37 = vld [vmem:[%s586_s4] ss:$0 sm:$0xff] }
  0xd2   :  { %145 = vadd.xlane.f32.xlu0 %v144_v45  ;;  %v276_v58 = vsel %vm143_vm2, %v268_v48, 0.0  ;;  %v271_v60 = vmin.f32 %v267_v57, 6.0 }
  0xd3   :  { %v136_v47 = vmin.f32 %v132_v44, 6.0  ;;  %v269_v56 = vmin.f32 %v265_v51, 6.0  ;;  %v153_v59 = vsel %vm143_vm2, %v138_v50, 0.0 }
  0xd4   :  { %v285_v63 = vsel %vm143_vm2, %v271_v60, 0.0 }
  0xd5   :  { %v147_v52 = vsel %vm143_vm2, %v136_v47, 0.0  ;;  %v279_v62 = vsel %vm143_vm2, %v269_v56, 0.0 }
  0xd6   :  { %148 = vadd.xlane.f32.xlu1 %v147_v52  ;;  %151 = vadd.xlane.f32.xlu0 %v150_v53 }
  0xda   :  { %277 = vadd.xlane.f32.xlu1 %v276_v58  ;;  %154 = vadd.xlane.f32.xlu0 %v153_v59 }
  0xde   :  { %283 = vadd.xlane.f32.xlu1 %v282_v61  ;;  %280 = vadd.xlane.f32.xlu0 %v279_v62 }
  0xe2   :  { %286 = vadd.xlane.f32.xlu0 %v285_v63 }
 0x15b   :  { %v146_v3 = vpop.xlane.xlu0 %145 }
 0x15c   :  { %v156_v4 = vadd.f32 %v146_v3, %v139_v2 }
 0x15e   :  { %161 = vst.msk [vmem:[#allocation2] sm:$0xff] %vm160_vm5, %v156_v4 }
 0x15f   :  { %v149_v7 = vpop.xlane.xlu1 %148  ;;  %v152_v8 = vpop.xlane.xlu0 %151 }
 0x160   :  { %v157_v9 = vadd.f32 %v149_v7, %v140_v5  ;;  %v158_v10 = vadd.f32 %v152_v8, %v141_v6 }
 0x162   :  { %162 = vst.msk [vmem:[#allocation2 + $0x8] sm:$0xff] %vm160_vm5, %v157_v9  ;;  %163 = vst.msk [vmem:[#allocation2 + $0x10] sm:$0xff] %vm160_vm5, %v158_v10 }
 0x163   :  { %v278_v12 = vpop.xlane.xlu1 %277  ;;  %v155_v13 = vpop.xlane.xlu0 %154 }
 0x164   :  { %v159_v14 = vadd.f32 %v155_v13, %v142_v11 }
 0x165   :  { %v272_v15 = vld [vmem:[#allocation2] sm:$0xff] }
 0x166   :  { %v288_v16 = vadd.f32 %v278_v12, %v272_v15  ;;  %164 = vst.msk [vmem:[#allocation2 + $0x18] sm:$0xff] %vm160_vm5, %v159_v14 }
 0x167   :  { %v281_v17 = vpop.xlane.xlu0 %280  ;;  %v284_v18 = vpop.xlane.xlu1 %283 }
 0x168   :  { %293 = vst.msk [vmem:[#allocation2] sm:$0xff] %vm292_vm6, %v288_v16 }
 0x169   :  { %v274_v19 = vld [vmem:[#allocation2 + $0x10] sm:$0xff]  ;;  %v273_v20 = vld [vmem:[#allocation2 + $0x8] sm:$0xff] }
 0x16a   :  { %v290_v21 = vadd.f32 %v284_v18, %v274_v19  ;;  %v289_v22 = vadd.f32 %v281_v17, %v273_v20 }
 0x16b   :  { %v287_v23 = vpop.xlane.xlu0 %286 }
 0x16c   :  { %295 = vst.msk [vmem:[#allocation2 + $0x10] sm:$0xff] %vm292_vm6, %v290_v21  ;;  %294 = vst.msk [vmem:[#allocation2 + $0x8] sm:$0xff] %vm292_vm6, %v289_v22 }
 0x16d   :  { %v275_v24 = vld [vmem:[#allocation2 + $0x18] sm:$0xff] }
 0x16e   :  { %v291_v25 = vadd.f32 %v287_v23, %v275_v24 }
 0x16f   :  { %v300_v26 = vld [vmem:[#allocation2] sm:$0xff] }
 0x170   :  { %296 = vst.msk [vmem:[#allocation2 + $0x18] sm:$0xff] %vm292_vm6, %v291_v25  ;;  %v304_v28 = vmul.f32 0.015625, %v300_v26 }
 0x173   :  { %v301_v27 = vld [vmem:[#allocation2 + $0x8] sm:$0xff]  ;;  %v302_v30 = vld [vmem:[#allocation2 + $0x10] sm:$0xff] }
 0x174   :  { %v305_v29 = vmul.f32 0.015625, %v301_v27  ;;  %v306_v33 = vmul.f32 0.015625, %v302_v30 }
 0x176   :  { %v308_v31 = vpack.c.bf16 %v305_v29, %v304_v28 }
 0x177   :  { %v303_v32 = vld [vmem:[#allocation2 + $0x18] sm:$0xff] }
 0x178   :  { %321 = vxpose.xlu1.c.b16.start [1/2] (short) (narrow) %v308_v31, 16  ;;  %v307_v34 = vmul.f32 0.015625, %v303_v32 }
 0x17a   :  { %v309_v35 = vpack.c.bf16 %v307_v34, %v306_v33 }
 0x17c   :  { %322 = vxpose.xlu1.c.b16.end [2/2] (short) (narrow) %v309_v35, 16 }
 0x1da   :  { %v329_v36 = vpop.trf.xlu1 }
 0x1db   :  { %447 = vmatmul.mubr.msk.bf16.vlgmr.msra.gmra.mxu0 %vm349_vm7, %v329_v36 }
 0x29b   :  { %v387_v38 = vpop.f32.mrf.mxu0 }
 0x29c   :  { %v388_v39 = vadd.f32 %v417_v37, %v387_v38 }
 0x29d   :  { %v448_v40 = vpop.f32.mrf.mxu0 }
 0x29e   :  { %393 = vst [vmem:[#allocation3] sm:$0x3] %v388_v39 }
 0x29f   :  { %v390_v41 = vpop.f32.mrf.mxu0 }
 0x2a0   :  { %475 = shalt.err (!%p472_p4)
}
 0x2a1   :  { %403 = dma.vmem_to_hbm [thread:$0]  %s401_s16, 32, %s587_s5, [#allocation4]   ;;  %v449_v42 = vpop.f32.mrf.mxu0 }
 0x2a2   :  { %484 = dma.done.wait [#allocation4], 32  }
 0x2a3   :  { %485 = vsyncadd [#allocation4], 4294967264 }
 0x2a4   :  { %407 = vsyncpa [#allocation4], 1 }

</bundles_post_ra>
